<compile_context>
chip_gen: v7x
topology: tpu7x:2x2x1
jax: 0.10.0
libtpu: 0.0.40
codegen_flags: <defaults>
</compile_context>

<pallas_src>
import jax
import jax.numpy as jnp
from jax import lax
from jax.experimental import pallas as pl
from jax.experimental.pallas import tpu as pltpu


def _fc_kernel(x_ref, w_ref, b_ref, o_ref):
    # x_ref: (TM, K)   latent rows
    # w_ref: (TN, K)   Linear weight tile, native (out_features, in_features)
    # b_ref: (1, TN)   bias tile
    # o_ref: (TM, TN)  output tile (lane-dense: TN multiple of 128 or full N)
    acc = lax.dot_general(
        x_ref[...], w_ref[...],
        dimension_numbers=(((1,), (1,)), ((), ())),   # contract on K (x @ W.T)
        preferred_element_type=jnp.float32,
    )
    o_ref[...] = (acc + b_ref[...].astype(jnp.float32)).astype(o_ref.dtype)


def latent_to_features_pallas(x, weight, bias, out_dim, *, tm=256, tn=512):
    """x: (B, latent_dim); weight: (prod(out_dim), latent_dim); bias: (prod(out_dim),).

    Returns y of shape (B, *out_dim), matching the PyTorch module's forward.
    """
    B, K = x.shape
    N = weight.shape[0]
    assert weight.shape[1] == K, "weight inner dim must equal latent_dim"
    n_out = 1
    for d in out_dim:
        n_out *= d
    assert n_out == N, "prod(out_dim) must equal weight.shape[0]"

    # Tile sizes: full dim if small (always legal), otherwise aligned tiles
    # (TM % 8 == 0, TN % 128 == 0). Ragged edge blocks are masked by Pallas.
    TM = B if B <= tm else tm
    TN = N if N <= tn else tn
    grid = (pl.cdiv(B, TM), pl.cdiv(N, TN))

    b2 = bias.reshape(1, N)   # glue: broadcastable bias row

    cost = pl.CostEstimate(
        flops=2 * B * K * N,
        transcendentals=0,
        bytes_accessed=(B * K + N * K + N + B * N) * x.dtype.itemsize,
    )

    out = pl.pallas_call(
        _fc_kernel,
        out_shape=jax.ShapeDtypeStruct((B, N), x.dtype),
        grid=grid,
        in_specs=[
            pl.BlockSpec((TM, K), lambda i, j: (i, 0)),   # latent rows
            pl.BlockSpec((TN, K), lambda i, j: (j, 0)),   # weight tile (no transpose)
            pl.BlockSpec((1, TN), lambda i, j: (0, j)),   # bias tile
        ],
        out_specs=pl.BlockSpec((TM, TN), lambda i, j: (i, j)),
        compiler_params=pltpu.CompilerParams(
            dimension_semantics=("parallel", "parallel"),
        ),
        cost_estimate=cost,
    )(x, weight, b2)

    return out.reshape((B,) + tuple(out_dim))   # glue: torch .view(-1, *out_dim)


if __name__ == "__main__":
    # Shapes consistent with the module: latent_dim=2, out_dim=(C,H,W)=(4,16,16)
    B = 2
    latent_dim = 2
    out_dim = (4, 16, 16)
    N = out_dim[0] * out_dim[1] * out_dim[2]

    key = jax.random.PRNGKey(0)
    kx, kw, kb = jax.random.split(key, 3)

    x = jax.random.normal(kx, (B, latent_dim), dtype=jnp.float32)
    # Deterministic init mimicking nn.Linear's uniform(-1/sqrt(K), 1/sqrt(K))
    bound = 1.0 / (latent_dim ** 0.5)
    weight = jax.random.uniform(kw, (N, latent_dim), jnp.float32, -bound, bound)
    bias = jax.random.uniform(kb, (N,), jnp.float32, -bound, bound)

    out = latent_to_features_pallas(x, weight, bias, out_dim)
    out = jax.block_until_ready(out)

    # Reference check in plain JAX
    ref = (x @ weight.T + bias).reshape(B, *out_dim)
    assert out.shape == (B,) + out_dim
    assert jnp.allclose(out, ref, atol=1e-4, rtol=1e-4)

    print("KERNEL_OK")
</pallas_src>

<mosaic_0001>
module attributes {stable_mosaic.version = 11 : i64} {
  func.func @_fc_kernel(%arg0: i32, %arg1: i32, %arg2: memref<2x2xf32, #tpu.memory_space<vmem>>, %arg3: memref<512x2xf32, #tpu.memory_space<vmem>>, %arg4: memref<1x512xf32, #tpu.memory_space<vmem>>, %arg5: memref<2x512xf32, #tpu.memory_space<vmem>>) attributes {dimension_semantics = [#tpu.dimension_semantics<parallel>, #tpu.dimension_semantics<parallel>], iteration_bounds = array<i64: 1, 2>, scalar_prefetch = 0 : i64, scratch_operands = 0 : i64, tpu.core_type = #tpu.core_type<tc>, window_params = [{transform_indices = @transform_0, window_bounds = array<i64: 2, 2>}, {transform_indices = @transform_1, window_bounds = array<i64: 512, 2>}, {transform_indices = @transform_2, window_bounds = array<i64: 1, 512>}, {transform_indices = @transform_3, window_bounds = array<i64: 2, 512>}]} {
    %c0 = arith.constant 0 : index
    %c0_0 = arith.constant 0 : index
    %0 = vector.load %arg2[%c0, %c0_0] : memref<2x2xf32, #tpu.memory_space<vmem>>, vector<2x2xf32>
    %c0_1 = arith.constant 0 : index
    %c0_2 = arith.constant 0 : index
    %1 = vector.load %arg3[%c0_1, %c0_2] : memref<512x2xf32, #tpu.memory_space<vmem>>, vector<512x2xf32>
    %cst = arith.constant dense<0.000000e+00> : vector<2x512xf32>
    %2 = tpu.matmul %0, %1, %cst {dimension_numbers = #tpu.dot_dimension_numbers<[1], [1], [0], [0], [0, 0, 1, 0], [], []>} : vector<2x2xf32>, vector<512x2xf32>, vector<2x512xf32> -> vector<2x512xf32>
    %c0_3 = arith.constant 0 : index
    %c0_4 = arith.constant 0 : index
    %3 = vector.load %arg4[%c0_3, %c0_4] : memref<1x512xf32, #tpu.memory_space<vmem>>, vector<1x512xf32>
    %4 = vector.broadcast %3 : vector<1x512xf32> to vector<2x512xf32>
    %5 = arith.addf %2, %4 : vector<2x512xf32>
    %c0_5 = arith.constant 0 : index
    %c0_6 = arith.constant 0 : index
    %6 = vector.load %arg5[%c0_5, %c0_6] : memref<2x512xf32, #tpu.memory_space<vmem>>, vector<2x512xf32>
    tpu.vector_store %arg5[%c0_5, %c0_6], %5 {strides = array<i32>} : memref<2x512xf32, #tpu.memory_space<vmem>>, vector<2x512xf32>,
    return
  }
  func.func @transform_0(%arg0: i32, %arg1: i32) -> (i32, i32) {
    %c0_i32 = arith.constant 0 : i32
    %c0_i32_0 = arith.constant 0 : i32
    return %arg0, %c0_i32 : i32, i32
  }
  func.func @transform_1(%arg0: i32, %arg1: i32) -> (i32, i32) {
    %c0_i32 = arith.constant 0 : i32
    %c0_i32_0 = arith.constant 0 : i32
    return %arg1, %c0_i32 : i32, i32
  }
  func.func @transform_2(%arg0: i32, %arg1: i32) -> (i32, i32) {
    %c0_i32 = arith.constant 0 : i32
    %c0_i32_0 = arith.constant 0 : i32
    return %c0_i32, %arg1 : i32, i32
  }
  func.func @transform_3(%arg0: i32, %arg1: i32) -> (i32, i32) {
    %c0_i32 = arith.constant 0 : i32
    return %arg0, %arg1 : i32, i32
  }
}

</mosaic_0001>

<bundles_post_ra>
// kernel: tpu_custom_call.1
= control target key start
LH: loop header
LB: loop body
LE: loop exit
PB: predicated region body
PF: predicated region fallthrough
CT: control target
= control target key end

     0   :  { %8 = vsyncpa [#allocation3], 0  ;;  %s1449_s0 = inlined_call_operand.vmem [shape: f32[2,2], index: 0, kind: input, shape index: {}]   ;;  %s1450_s1 = inlined_call_operand.vmem [shape: f32[1024,2], index: 1, kind: input, shape index: {}]   ;;  %s1451_s2 = inlined_call_operand.vmem [shape: f32[1,1024], index: 2, kind: input, shape index: {}]   ;;  %s1452_s3 = inlined_call_operand.hbm [shape: f32[2,1024], index: 3, kind: output, shape index: {}]  }
   0x1   :  { %10 = vsyncpa [#allocation3 + $0x1], 0  ;;  %s1185_s12 = smov 0   ;;  %s1187_s13 = smov 0  }
   0x2   :  { %s1189_s14 = smov 0   ;;  %s1191_s15 = smov 0  }
   0x3   :  { %s1193_s16 = smov 0   ;;  %s1195_s17 = smov 0  }
   0x4 LB: > { %s781_s18 = sadd.s32 4294967295, %s1161_s17   ;;  %s782_s19 = sadd.s32 4294967294, %s1161_s17   ;;  %s1161_s17 = sphi %s1195_s17, %s16_s17   ;;  %s1157_s16 = sphi %s1193_s16, %s1461_s16   ;;  %s1153_s15 = sphi %s1191_s15, %s1460_s15   ;;  %s1149_s14 = sphi %s1189_s14, %s1459_s14   ;;  %s1145_s13 = sphi %s1187_s13, %s1458_s13   ;;  %s1141_s12 = sphi %s1185_s12, %s1457_s12  }
   0x5   : > { %s25_s20 = sadd.s32 1, %s1157_s16  ;;  %s115_s21 = sadd.s32 1, %s1149_s14 }
   0x6   : > { %p26_p0 = scmp.ge.s32.totalorder %s25_s20, 2  ;;  %p125_p1 = scmp.ne.s32.totalorder %s1149_s14, %s1145_s13 }
   0x7   : > { %p126_p2 = scmp.eq.s32.totalorder %s781_s18, 1  ;;  %p131_p3 = scmp.ne.s32.totalorder %s1145_s13, %s1141_s12 }
   0x8   : > { %s1463_s20 = smov (%p26_p0, %s25_s20), 0  ;;  %p132_p5 = scmp.eq.s32.totalorder %s782_s19, 1 }
   0x9   : > { %p1225_p4 = por %p126_p2, %p125_p1  ;;  %s111_s23 = ssub.s32 %s1157_s16, %s1463_s20 }
   0xa   : > { %p786_p6 = scmp.ge.s32.totalorder %s1161_s17, 1  ;;  %p113_p7 = scmp.eq.s32.totalorder %s111_s23, 0 }
   0xb   : > { %p1232_p8 = por %p132_p5, %p131_p3  ;;  %p174_p9 = scmp.lt.s32.totalorder %s1161_s17, 3 }
   0xc   : > { %s1238_s25 = scalar_select %p113_p7, %s1149_s14, %s115_s21  }
   0xd   : > { %p175_p10 = pnand %p786_p6, %p174_p9 }
   0xe   : > { %s788_s26 = sshll.u32 (!%p175_p10), %s1153_s15, 6  ;;  %vm309_vm0 = vcmask (!%p175_p10), 15360   ;;  %v1244_v0 = vld [vmem:[%s1449_s0] sm:$0x3] (!%p175_p10)  ;;  %s790_s6 = sshll.u32 (!%p175_p10), %s1153_s15, 2 }
   0xf   : > { %178 = sbr.rel (%p175_p10) target bundleno = 329 (0x149), region = 32  ;;  %p211_p11 = scmp.lt.s32.totalorder (!%p175_p10), %s788_s26, 127  ;;  %895 = vmatprep.mubr.msk.f32.mxu0 (!%p175_p10), %vm309_vm0, %v1244_v0  ;;  %929 = vmatprep.mubr.msk.f32.mxu1 (!%p175_p10), %vm309_vm0, %v1244_v0  ;;  %vm1257_vm1 = vmpackc.low (!%p175_p10), %vm309_vm0, %vm309_vm0 }
  0x10   : > { %p217_p12 = scmp.lt.s32.totalorder (!%p175_p10), %s790_s6, 7  ;;  %s203_s10 = sand.u32 (!%p175_p10), 1, %s1145_s13  }
  0x11   : > { %s787_s11 = sshll.u32 (!%p175_p10), %s203_s10, 3  ;;  %s862_s18 = sshll.u32 (!%p175_p10), %s1153_s15, 7 }
  0x12   : > { %s205_s19 = scalar_lea.vmem (!%p175_p10), [#allocation2], %s787_s11  ;;  %s1402_s27 = scalar_lea.hbm (!%p175_p10), %s1452_s3, %s862_s18 }
  0x13   : > { %s687_s21 = sshll.u32 (!%p175_p10), %s205_s19, 4  ;;  %s671_s28 = scalar_lea.sflag (!%p175_p10), [#allocation3], %s203_s10  ;;  %s1404_s21 = int_to_ptr.vmem [resolvable:$true] %s687_s21 }
  0x14   : > { %s1164_s15 = smov (!%p175_p10), [#allocation2]  }
  0x15   : > { %s1087_s30 = sshll.u32 (!%p175_p10), %s1164_s15, 4  ;;  %s1088_s30 = int_to_ptr.vmem [resolvable:$false] %s1087_s30 }
  0x16   : > { %s1465_s26 = smov (!%p211_p11, %s788_s26), 127  ;;  %s1467_s6 = smov (!%p217_p12, %s790_s6), 7 }
  0x17   : > { %s789_s29 = sshll.u32 %s1465_s26, 3  ;;  %s219_s9 = scalar_lea.vmem %s1451_s2, %s1467_s6 }
  0x18   : > { %s1253_s5 = scalar_lea.vmem %s1450_s1, %s789_s29  ;;  %s1083_s29 = scalar_lea.vmem %s1404_s21, 128 }
  0x19   : > { %v239_v2 = vld [vmem:[%s1253_s5 + $0x80] sm:$0xff]  ;;  %v240_v3 = vld [vmem:[%s1253_s5 + $0x88] sm:$0xff]  ;;  %v241_v13 = vld [vmem:[%s1253_s5 + $0x90] sm:$0xff]  ;;  %p1084_p13 = scmp.ne.s32.totalorder %s1404_s21, %s1083_s29  ;;  %s1089_s4 = scalar_lea.vmem %s1088_s30, 256 }
  0x1a   : > { %v271_v4 = vld [vmem:[%s1253_s5 + $0x180] sm:$0xff]  ;;  %v931_v5 = vpack.c.bf16 %v240_v3, %v239_v2  ;;  %v272_v6 = vld [vmem:[%s1253_s5 + $0x188] sm:$0xff]  ;;  %v242_v15 = vld [vmem:[%s1253_s5 + $0x98] sm:$0xff]  ;;  %p1090_p2 = scmp.lt.s32.totalorder %s1404_s21, %s1088_s30  ;;  %p1091_p3 = scmp.lt.s32.totalorder %s1089_s4, %s1083_s29 }
  0x1b   : > { %v223_v7 = vld [vmem:[%s1253_s5] sm:$0xff]  ;;  %v224_v8 = vld [vmem:[%s1253_s5 + $0x8] sm:$0xff]  ;;  %v979_v9 = vpack.c.bf16 %v272_v6, %v271_v4  ;;  %v273_v16 = vld [vmem:[%s1253_s5 + $0x190] sm:$0xff]  ;;  %v937_v18 = vpack.c.bf16 %v242_v15, %v241_v13  ;;  %p1085_p0 = pnand %p1084_p13, %p1225_p4 }
  0x1c   : > { %v934_v10 = vpack.c.bf16 %v224_v8, %v223_v7  ;;  %v255_v11 = vld [vmem:[%s1253_s5 + $0x100] sm:$0xff]  ;;  %v256_v12 = vld [vmem:[%s1253_s5 + $0x108] sm:$0xff]  ;;  %933 = vmatprep.subr.msk.bf16.mxu0 %vm1257_vm1, %v931_v5  ;;  %v274_v17 = vld [vmem:[%s1253_s5 + $0x198] sm:$0xff]  ;;  %p1092_p5 = por %p1091_p3, %p1090_p2 }
  0x1d   : > { %v982_v14 = vpack.c.bf16 %v256_v12, %v255_v11  ;;  %981 = vmatprep.subr.msk.bf16.mxu1 %vm1257_vm1, %v979_v9  ;;  %v985_v19 = vpack.c.bf16 %v274_v17, %v273_v16  ;;  %v225_v20 = vld [vmem:[%s1253_s5 + $0x10] sm:$0xff]  ;;  %v226_v21 = vld [vmem:[%s1253_s5 + $0x18] sm:$0xff]  ;;  %v243_v24 = vld [vmem:[%s1253_s5 + $0xa0] sm:$0xff]  ;;  %p1086_p1 = pneg %p1085_p0 }
  0x1e   : > { %936 = vmatpush3.bf16.xpose.msk.msra.mxu0 %vm1257_vm1, %v934_v10  ;;  %v257_v22 = vld [vmem:[%s1253_s5 + $0x110] sm:$0xff]  ;;  %v258_v23 = vld [vmem:[%s1253_s5 + $0x118] sm:$0xff]  ;;  %v244_v25 = vld [vmem:[%s1253_s5 + $0xa8] sm:$0xff]  ;;  %v940_v28 = vpack.c.bf16 %v226_v21, %v225_v20 }
  0x1f   : > { %984 = vmatpush3.bf16.xpose.msk.msra.mxu1 %vm1257_vm1, %v982_v14  ;;  %939 = vmatprep.subr.msk.bf16.mxu0 %vm1257_vm1, %v937_v18  ;;  %v275_v26 = vld [vmem:[%s1253_s5 + $0x1a0] sm:$0xff]  ;;  %v276_v27 = vld [vmem:[%s1253_s5 + $0x1a8] sm:$0xff]  ;;  %v988_v29 = vpack.c.bf16 %v258_v23, %v257_v22  ;;  %v943_v30 = vpack.c.bf16 %v244_v25, %v243_v24  ;;  %v245_v36 = vld [vmem:[%s1253_s5 + $0xb0] sm:$0xff]  ;;  %p1093_p6 = pnand %p1092_p5, %p1086_p1 }
  0x20   : > { %987 = vmatprep.subr.msk.bf16.mxu1 %vm1257_vm1, %v985_v19  ;;  %v991_v31 = vpack.c.bf16 %v276_v27, %v275_v26  ;;  %v227_v32 = vld [vmem:[%s1253_s5 + $0x20] sm:$0xff]  ;;  %v228_v33 = vld [vmem:[%s1253_s5 + $0x28] sm:$0xff]  ;;  %v246_v37 = vld [vmem:[%s1253_s5 + $0xb8] sm:$0xff] }
  0x21   : > { %v259_v34 = vld [vmem:[%s1253_s5 + $0x120] sm:$0xff]  ;;  %v260_v35 = vld [vmem:[%s1253_s5 + $0x128] sm:$0xff]  ;;  %v277_v38 = vld [vmem:[%s1253_s5 + $0x1b0] sm:$0xff]  ;;  %v946_v40 = vpack.c.bf16 %v228_v33, %v227_v32  ;;  %v949_v42 = vpack.c.bf16 %v246_v37, %v245_v36  ;;  %v289_v36 = vlaneseq }
  0x22   : > { %v278_v39 = vld [vmem:[%s1253_s5 + $0x1b8] sm:$0xff]  ;;  %v994_v41 = vpack.c.bf16 %v260_v35, %v259_v34  ;;  %v229_v44 = vld [vmem:[%s1253_s5 + $0x30] sm:$0xff]  ;;  %v247_v48 = vld [vmem:[%s1253_s5 + $0xc0] sm:$0xff] }
  0x23   : > { %v997_v43 = vpack.c.bf16 %v278_v39, %v277_v38  ;;  %v230_v45 = vld [vmem:[%s1253_s5 + $0x38] sm:$0xff]  ;;  %v261_v46 = vld [vmem:[%s1253_s5 + $0x130] sm:$0xff]  ;;  %v248_v49 = vld [vmem:[%s1253_s5 + $0xc8] sm:$0xff]  ;;  %v290_v37 = vshrl.u32 %v289_v36, 7 }
  0x24   : > { %v262_v47 = vld [vmem:[%s1253_s5 + $0x138] sm:$0xff]  ;;  %v279_v50 = vld [vmem:[%s1253_s5 + $0x1c0] sm:$0xff]  ;;  %v280_v51 = vld [vmem:[%s1253_s5 + $0x1c8] sm:$0xff]  ;;  %v952_v52 = vpack.c.bf16 %v230_v45, %v229_v44  ;;  %v955_v54 = vpack.c.bf16 %v248_v49, %v247_v48 }
  0x25   : > { %v1000_v53 = vpack.c.bf16 %v262_v47, %v261_v46  ;;  %v1003_v55 = vpack.c.bf16 %v280_v51, %v279_v50  ;;  %v231_v56 = vld [vmem:[%s1253_s5 + $0x40] sm:$0xff]  ;;  %v232_v57 = vld [vmem:[%s1253_s5 + $0x48] sm:$0xff]  ;;  %v249_v60 = vld [vmem:[%s1253_s5 + $0xd0] sm:$0xff]  ;;  %v291_v38 = vsub.s32 0, %v290_v37  ;;  %v299_v1 = vsub.s32 2, %v290_v37 }
  0x26   : > { %942 = vmatpush3.bf16.xpose.msk.msra.mxu0 %vm1257_vm1, %v940_v28  ;;  %v263_v58 = vld [vmem:[%s1253_s5 + $0x140] sm:$0xff]  ;;  %v264_v59 = vld [vmem:[%s1253_s5 + $0x148] sm:$0xff]  ;;  %v250_v61 = vld [vmem:[%s1253_s5 + $0xd8] sm:$0xff]  ;;  %v958_v2 = vpack.c.bf16 %v232_v57, %v231_v56 }
  0x27   : > { %990 = vmatpush3.bf16.xpose.msk.msra.mxu1 %vm1257_vm1, %v988_v29  ;;  %945 = vmatprep.subr.msk.bf16.mxu0 %vm1257_vm1, %v943_v30  ;;  %v281_v62 = vld [vmem:[%s1253_s5 + $0x1d0] sm:$0xff]  ;;  %v282_v63 = vld [vmem:[%s1253_s5 + $0x1d8] sm:$0xff]  ;;  %v1006_v3 = vpack.c.bf16 %v264_v59, %v263_v58  ;;  %v961_v4 = vpack.c.bf16 %v250_v61, %v249_v60  ;;  %v251_v10 = vld [vmem:[%s1253_s5 + $0xe0] sm:$0xff] }
  0x28   : > { %993 = vmatprep.subr.msk.bf16.mxu1 %vm1257_vm1, %v991_v31  ;;  %v1009_v5 = vpack.c.bf16 %v282_v63, %v281_v62  ;;  %v233_v6 = vld [vmem:[%s1253_s5 + $0x50] sm:$0xff]  ;;  %v234_v7 = vld [vmem:[%s1253_s5 + $0x58] sm:$0xff]  ;;  %v252_v11 = vld [vmem:[%s1253_s5 + $0xe8] sm:$0xff] }
  0x29   : > { %v265_v8 = vld [vmem:[%s1253_s5 + $0x150] sm:$0xff]  ;;  %v266_v9 = vld [vmem:[%s1253_s5 + $0x158] sm:$0xff]  ;;  %v283_v12 = vld [vmem:[%s1253_s5 + $0x1e0] sm:$0xff]  ;;  %v964_v14 = vpack.c.bf16 %v234_v7, %v233_v6  ;;  %v967_v16 = vpack.c.bf16 %v252_v11, %v251_v10 }
  0x2a   : > { %v284_v13 = vld [vmem:[%s1253_s5 + $0x1e8] sm:$0xff]  ;;  %v1012_v15 = vpack.c.bf16 %v266_v9, %v265_v8  ;;  %v235_v18 = vld [vmem:[%s1253_s5 + $0x60] sm:$0xff]  ;;  %v253_v22 = vld [vmem:[%s1253_s5 + $0xf0] sm:$0xff] }
  0x2b   : > { %v1015_v17 = vpack.c.bf16 %v284_v13, %v283_v12  ;;  %v236_v19 = vld [vmem:[%s1253_s5 + $0x68] sm:$0xff]  ;;  %v267_v20 = vld [vmem:[%s1253_s5 + $0x160] sm:$0xff]  ;;  %v254_v23 = vld [vmem:[%s1253_s5 + $0xf8] sm:$0xff] }
  0x2c   : > { %v268_v21 = vld [vmem:[%s1253_s5 + $0x168] sm:$0xff]  ;;  %v285_v24 = vld [vmem:[%s1253_s5 + $0x1f0] sm:$0xff]  ;;  %v286_v25 = vld [vmem:[%s1253_s5 + $0x1f8] sm:$0xff]  ;;  %v970_v26 = vpack.c.bf16 %v236_v19, %v235_v18  ;;  %v973_v28 = vpack.c.bf16 %v254_v23, %v253_v22 }
  0x2d   : > { %v1018_v27 = vpack.c.bf16 %v268_v21, %v267_v20  ;;  %v1021_v29 = vpack.c.bf16 %v286_v25, %v285_v24  ;;  %v237_v30 = vld [vmem:[%s1253_s5 + $0x70] sm:$0xff]  ;;  %v238_v31 = vld [vmem:[%s1253_s5 + $0x78] sm:$0xff]  ;;  %v287_v39 = vld [vmem:[%s219_s9] sm:$0xf] }
  0x2e   : > { %948 = vmatpush3.bf16.xpose.msk.msra.mxu0 %vm1257_vm1, %v946_v40  ;;  %v269_v32 = vld [vmem:[%s1253_s5 + $0x170] sm:$0xff]  ;;  %v270_v33 = vld [vmem:[%s1253_s5 + $0x178] sm:$0xff]  ;;  %v976_v34 = vpack.c.bf16 %v238_v31, %v237_v30  ;;  %v295_v40 = vsub.s32 1, %v290_v37  ;;  %v292_v44 = vrot.slane %v287_v39, %v291_v38  ;;  %v300_v45 = vrot.slane %v287_v39, %v299_v1 }
  0x2f   : > { %996 = vmatpush3.bf16.xpose.msk.msra.mxu1 %vm1257_vm1, %v994_v41  ;;  %951 = vmatprep.subr.msk.bf16.mxu0 %vm1257_vm1, %v949_v42  ;;  %v1024_v35 = vpack.c.bf16 %v270_v33, %v269_v32  ;;  %v1163_v41 = vmov 1983009808  }
  0x30   : > { %999 = vmatprep.subr.msk.bf16.mxu1 %vm1257_vm1, %v997_v43  ;;  %v654_v42 = vunpack.c.l.s4 %v1163_v41  ;;  %v303_v43 = vsub.s32 3, %v290_v37 }
  0x32   : > { %v655_v46 = vunpack.c.0.s8 %v654_v42  ;;  %v304_v47 = vrot.slane %v287_v39, %v303_v43 }
  0x36   : > { %954 = vmatpush3.bf16.xpose.msk.msra.mxu0 %vm1257_vm1, %v952_v52 }
  0x37   : > { %1002 = vmatpush3.bf16.xpose.msk.msra.mxu1 %vm1257_vm1, %v1000_v53  ;;  %957 = vmatprep.subr.msk.bf16.mxu0 %vm1257_vm1, %v955_v54  ;;  %v658_v54 = vsub.s32 %v655_v46, %v290_v37 }
  0x38   : > { %1005 = vmatprep.subr.msk.bf16.mxu1 %vm1257_vm1, %v1003_v55 }
  0x3e   : > { %960 = vmatpush3.bf16.xpose.msk.msra.mxu0 %vm1257_vm1, %v958_v2 }
  0x3f   : > { %1008 = vmatpush3.bf16.xpose.msk.msra.mxu1 %vm1257_vm1, %v1006_v3  ;;  %963 = vmatprep.subr.msk.bf16.mxu0 %vm1257_vm1, %v961_v4 }
  0x40   : > { %1011 = vmatprep.subr.msk.bf16.mxu1 %vm1257_vm1, %v1009_v5 }
  0x46   : > { %966 = vmatpush3.bf16.xpose.msk.msra.mxu0 %vm1257_vm1, %v964_v14 }
  0x47   : > { %1014 = vmatpush3.bf16.xpose.msk.msra.mxu1 %vm1257_vm1, %v1012_v15  ;;  %969 = vmatprep.subr.msk.bf16.mxu0 %vm1257_vm1, %v967_v16 }
  0x48   : > { %1017 = vmatprep.subr.msk.bf16.mxu1 %vm1257_vm1, %v1015_v17 }
  0x4e   : > { %972 = vmatpush3.bf16.xpose.msk.msra.mxu0 %vm1257_vm1, %v970_v26 }
  0x4f   : > { %1020 = vmatpush3.bf16.xpose.msk.msra.mxu1 %vm1257_vm1, %v1018_v27  ;;  %975 = vmatprep.subr.msk.bf16.mxu0 %vm1257_vm1, %v973_v28 }
  0x50   : > { %1023 = vmatprep.subr.msk.bf16.mxu1 %vm1257_vm1, %v1021_v29 }
  0x56   : > { %978 = vmatpush3.bf16.xpose.msk.msra.mxu0 %vm1257_vm1, %v976_v34 }
  0x57   : > { %1026 = vmatpush3.bf16.xpose.msk.msra.mxu1 %vm1257_vm1, %v1024_v35 }
  0x5d   : > { %896 = vmatmul.mubr.msk.f32.vlgmr.msra.gmra.mrb[0].mxu0 %vm309_vm0, %v1244_v0 }
  0x5e   : > { %930 = vmatmul.mubr.msk.f32.vlgmr.msra.gmra.mrb[0].mxu1 %vm309_vm0, %v1244_v0  ;;  %v296_v0 = vrot.slane %v287_v39, %v295_v40 }
 0x130   : > { %v571_v48 = vpop.f32.mrb[0].mxu0 }
 0x131   : > { %v572_v49 = vadd.f32 %v571_v48, %v292_v44  ;;  %v642_v50 = vpop.f32.mrb[0].mxu1  ;;  %v573_v51 = vpop.f32.mrb[1].mxu0 }
 0x132   : > { %v643_v52 = vadd.f32 %v642_v50, %v300_v45  ;;  %v574_v53 = vadd.f32 %v573_v51, %v296_v0  ;;  %v644_v55 = vpop.f32.mrb[1].mxu1 }
 0x133   : > { %v645_v56 = vadd.f32 %v644_v55, %v304_v47 }
 0x134   : > { %v651_v57 = vcombine.low %v572_v49, %v574_v53 }
 0x135   : > { %v652_v58 = vcombine.low %v643_v52, %v645_v56 }
 0x136   : > { %v659_v59 = vrot.slane %v651_v57, %v658_v54 }
 0x137   : > { %v666_v60 = vrot.slane %v652_v58, %v658_v54 }
 0x139   : > { %v667_v61 = vcombine.low %v659_v59, %v666_v60 }
 0x13b   : > { %669 = vst [vmem:[%s205_s19] sm:$0xff] %v667_v61 }
 0x13c   : > { %1096 = shalt.err (!%p1093_p6)
}
 0x13d   : > { %s1097_s5 = scalar_lea.hbm %s1402_s27, 128  ;;  %s1101_s8 = scalar_lea.hbm %s1452_s3, 256 }
 0x13e   : > { %p1098_p7 = scmp.ne.s32.totalorder %s1402_s27, %s1097_s5  ;;  %p1102_p11 = scmp.lt.u32.totalorder %s1402_s27, %s1452_s3 }
 0x13f   : > { %p1103_p12 = scmp.lt.u32.totalorder %s1101_s8, %s1097_s5  ;;  %p1105_p0 = scmp.lt.u32.totalorder %s1097_s5, %s1402_s27 }
 0x140   : > { %p1099_p9 = pnand %p1098_p7, %p1225_p4 }
 0x141   : > { %p1104_p13 = por %p1103_p12, %p1102_p11 }
 0x142   : > { %p1100_p10 = pneg %p1099_p9 }
 0x143   : > { %p1106_p1 = por %p1105_p0, %p1104_p13 }
 0x145   : > { %p1107_p2 = pnand %p1106_p1, %p1100_p10 }
 0x147   : > { %1110 = shalt.err (!%p1107_p2)
}
 0x148   : > { %1027 = dma.vmem_to_hbm [thread:$0]  (%p1225_p4), %s1404_s21, 128, %s1402_s27, %s671_s28  }
 0x149 PF: > { %p1033_p3 = scmp.ge.s32.totalorder %s1161_s17, 2  ;;  %s699_s11 = sand.u32 1, %s1141_s12  }
 0x14a   : > { %s700_s18 = scalar_lea.sflag [#allocation3], %s699_s11 }
 0x14b   : > { %p1030_p5 = pnand %p1033_p3, %p1232_p8 }
 0x14d   : > { %1136 = dma.done.wait (!%p1030_p5), %s700_s18, 128  }
 0x14e   : > { %1138 = vsyncadd (!%p1030_p5), %s700_s18, 4294967168  ;;  %s16_s17 = sadd.s32 1, %s1161_s17   ;;  %s1457_s12 = smov %s1145_s13 }
 0x14f   : > { %p13_p6 = scmp.ge.s32.totalorder %s16_s17, 4   ;;  %s1458_s13 = smov %s1149_s14 }
 0x150   : > { %s1459_s14 = smov %s1238_s25  ;;  %s1460_s15 = smov %s1157_s16 }
 0x151   : > { %s1461_s16 = smov %s1463_s20  ;;  %15 = sbr.rel (!%p13_p6) target bundleno = 4 (0x4), region = 73 }
 0x158   :  { %705 = vsyncpa [#allocation3], 1 }
 0x159   :  { %707 = vsyncpa [#allocation3 + $0x1], 1 }

</bundles_post_ra>
